<compile_context>
chip_gen: v7x
topology: tpu7x:2x2x1
jax: 0.10.0
libtpu: 0.0.40
codegen_flags: <defaults>
</compile_context>

<pallas_src>
import jax
import jax.numpy as jnp
from jax.experimental import pallas as pl
from jax.experimental.pallas import tpu as pltpu

_LANE = 128


def _make_quantile_loss_kernel(true_b: int, tile_b: int, denom: int):
    inv_denom = 1.0 / float(denom)

    def kernel(preds_ref, target_ref, alphas_ref, out_ref):
        i = pl.program_id(0)

        @pl.when(i == 0)
        def _():
            out_ref[...] = jnp.zeros_like(out_ref)

        preds = preds_ref[...].astype(jnp.float32)    # [Q, TB]  (lane-dense)
        target = target_ref[...].astype(jnp.float32)  # [1, TB]  -> broadcasts over Q
        alphas = alphas_ref[...]                      # [Q, 1]   -> broadcasts over B

        delta = target - preds                        # y - y_hat
        ad = alphas * delta
        loss = jnp.maximum(ad, ad - delta)            # == max(a*d, (a-1)*d)

        # Mask padded tail lanes (batch index >= true_b) before reducing.
        col = jax.lax.broadcasted_iota(jnp.int32, loss.shape, 1) + i * tile_b
        loss = jnp.where(col < true_b, loss, jnp.float32(0.0))

        out_ref[...] += jnp.sum(loss)

        @pl.when(i == pl.num_programs(0) - 1)
        def _():
            out_ref[...] = out_ref[...] * jnp.float32(inv_denom)

    return kernel


def quantile_loss(preds: jax.Array, target: jax.Array, quantiles, *, tile_b: int = 32768) -> jax.Array:
    """preds: [B, Q] (any float dtype), target: [B, 1] or [B]. Returns scalar f32 loss."""
    B, Q = preds.shape
    assert len(quantiles) == Q

    # Lane-dense presentation: batch on the lane axis.
    preds_t = preds.T                                    # [Q, B], original dtype
    target_row = jnp.reshape(target, (1, B))             # [1, B], original dtype
    alphas = jnp.asarray(quantiles, dtype=jnp.float32).reshape(Q, 1)

    # Tile the batch (lane) axis in multiples of 128, no larger than needed.
    b_ceil = pl.cdiv(B, _LANE) * _LANE
    tb = min(int(tile_b), b_ceil)
    tb = pl.cdiv(tb, _LANE) * _LANE
    num_tiles = pl.cdiv(B, tb)
    b_pad = num_tiles * tb

    if b_pad != B:
        preds_t = jnp.pad(preds_t, ((0, 0), (0, b_pad - B)))
        target_row = jnp.pad(target_row, ((0, 0), (0, b_pad - B)))

    kernel = _make_quantile_loss_kernel(true_b=B, tile_b=tb, denom=B * Q)

    out = pl.pallas_call(
        kernel,
        out_shape=jax.ShapeDtypeStruct((1, 1), jnp.float32),
        grid_spec=pltpu.PrefetchScalarGridSpec(
            num_scalar_prefetch=0,
            grid=(num_tiles,),
            in_specs=[
                pl.BlockSpec((Q, tb), lambda i: (0, i)),   # preds  [Q, B_pad]
                pl.BlockSpec((1, tb), lambda i: (0, i)),   # target [1, B_pad]
                pl.BlockSpec((Q, 1), lambda i: (0, 0)),    # alphas [Q, 1] (resident)
            ],
            out_specs=pl.BlockSpec((1, 1), lambda i: (0, 0)),  # resident accumulator
        ),
        compiler_params=pltpu.CompilerParams(
            dimension_semantics=("arbitrary",),  # reduction axis: accumulate sequentially
        ),
        # TODO(synk): on v7x, add a leading size-2 "parallel" axis with a [2,1]
        # partial-sum output (summed in the wrapper) to use both TensorCores.
    )(preds_t, target_row, alphas)
    return out[0, 0]


def quantile_loss_ref(preds, target, quantiles):
    """Pure-JAX reference mirroring the PyTorch loop exactly."""
    y = target.reshape(-1).astype(jnp.float32)
    p = preds.astype(jnp.float32)
    per_q = []
    for idx, alpha in enumerate(quantiles):
        d = y - p[:, idx]
        per_q.append(jnp.mean(jnp.maximum(alpha * d, (alpha - 1.0) * d)))
    return jnp.mean(jnp.stack(per_q))


if __name__ == "__main__":
    quantiles = [0.1, 0.5, 0.9]
    B, Q = 300, len(quantiles)   # B not a multiple of 128 -> exercises tail masking

    key = jax.random.PRNGKey(0)
    k_preds, k_target = jax.random.split(key)
    preds = jax.random.normal(k_preds, (B, Q), dtype=jnp.float32)
    target = jax.random.normal(k_target, (B, 1), dtype=jnp.float32)

    # Small tile to force a multi-step grid (accumulator path).
    loss = quantile_loss(preds, target, quantiles, tile_b=128)
    jax.block_until_ready(loss)
    ref = quantile_loss_ref(preds, target, quantiles)
    assert jnp.allclose(loss, ref, rtol=1e-5, atol=1e-6), (loss, ref)

    # bf16 inputs stay bf16 over the wire; kernel upcasts to f32 internally.
    preds_bf16 = preds.astype(jnp.bfloat16)
    target_bf16 = target.astype(jnp.bfloat16)
    loss_bf16 = quantile_loss(preds_bf16, target_bf16, quantiles)
    jax.block_until_ready(loss_bf16)
    ref_bf16 = quantile_loss_ref(preds_bf16.astype(jnp.float32),
                                 target_bf16.astype(jnp.float32), quantiles)
    assert jnp.allclose(loss_bf16, ref_bf16, rtol=1e-4, atol=1e-5), (loss_bf16, ref_bf16)

    print("KERNEL_OK")
</pallas_src>

<mosaic_0001>
module attributes {stable_mosaic.version = 11 : i64} {
  func.func @kernel(%arg0: i32, %arg1: memref<3x128xf32, #tpu.memory_space<vmem>>, %arg2: memref<1x128xf32, #tpu.memory_space<vmem>>, %arg3: memref<3x1xf32, #tpu.memory_space<vmem>>, %arg4: memref<1x1xf32, #tpu.memory_space<vmem>>) attributes {dimension_semantics = [#tpu.dimension_semantics<arbitrary>], iteration_bounds = array<i64: 3>, scalar_prefetch = 0 : i64, scratch_operands = 0 : i64, tpu.core_type = #tpu.core_type<tc>, window_params = [{transform_indices = @transform_0, window_bounds = array<i64: 3, 128>}, {transform_indices = @transform_1, window_bounds = array<i64: 1, 128>}, {pipeline_mode = #tpu.pipeline_mode<synchronous>, transform_indices = @transform_2, window_bounds = array<i64: 3, 1>}, {pipeline_mode = #tpu.pipeline_mode<synchronous>, transform_indices = @transform_3, window_bounds = array<i64: 1, 1>}]} {
    %c0_i32 = arith.constant 0 : i32
    %0 = arith.cmpi eq, %arg0, %c0_i32 : i32
    %1 = arith.extui %0 : i1 to i32
    %c0_i32_0 = arith.constant 0 : i32
    %2 = arith.cmpi ne, %1, %c0_i32_0 : i32
    scf.if %2 {
      %cst_12 = arith.constant 0.000000e+00 : f32
      %31 = vector.broadcast %cst_12 : f32 to vector<1x1xf32>
      %c0_13 = arith.constant 0 : index
      %c0_14 = arith.constant 0 : index
      %32 = vector.load %arg4[%c0_13, %c0_14] : memref<1x1xf32, #tpu.memory_space<vmem>>, vector<1x1xf32>
      tpu.vector_store %arg4[%c0_13, %c0_14], %31 {strides = array<i32>} : memref<1x1xf32, #tpu.memory_space<vmem>>, vector<1x1xf32>,
    } else {
    }
    %c0 = arith.constant 0 : index
    %c0_1 = arith.constant 0 : index
    %3 = vector.load %arg1[%c0, %c0_1] : memref<3x128xf32, #tpu.memory_space<vmem>>, vector<3x128xf32>
    %c0_2 = arith.constant 0 : index
    %c0_3 = arith.constant 0 : index
    %4 = vector.load %arg2[%c0_2, %c0_3] : memref<1x128xf32, #tpu.memory_space<vmem>>, vector<1x128xf32>
    %c0_4 = arith.constant 0 : index
    %c0_5 = arith.constant 0 : index
    %5 = vector.load %arg3[%c0_4, %c0_5] : memref<3x1xf32, #tpu.memory_space<vmem>>, vector<3x1xf32>
    %6 = vector.broadcast %4 : vector<1x128xf32> to vector<3x128xf32>
    %7 = arith.subf %6, %3 : vector<3x128xf32>
    %8 = vector.broadcast %5 : vector<3x1xf32> to vector<3x128xf32>
    %9 = arith.mulf %8, %7 : vector<3x128xf32>
    %10 = arith.subf %9, %7 : vector<3x128xf32>
    %11 = arith.maximumf %9, %10 : vector<3x128xf32>
    %12 = tpu.iota {dimensions = array<i32: 1>} : vector<3x128xi32>
    %c128_i32 = arith.constant 128 : i32
    %13 = arith.muli %arg0, %c128_i32 : i32
    %14 = vector.broadcast %13 : i32 to vector<3x128xi32>
    %15 = arith.addi %12, %14 : vector<3x128xi32>
    %c300_i32 = arith.constant 300 : i32
    %16 = vector.broadcast %c300_i32 : i32 to vector<3x128xi32>
    %17 = arith.cmpi slt, %15, %16 : vector<3x128xi32>
    %cst = arith.constant 0.000000e+00 : f32
    %18 = vector.broadcast %cst : f32 to vector<3x128xf32>
    %19 = arith.select %17, %11, %18 : vector<3x128xi1>, vector<3x128xf32>
    %c0_6 = arith.constant 0 : index
    %c0_7 = arith.constant 0 : index
    %20 = vector.load %arg4[%c0_6, %c0_7] : memref<1x1xf32, #tpu.memory_space<vmem>>, vector<1x1xf32>
    %21 = vector.shape_cast %19 : vector<3x128xf32> to vector<1x3x128xf32>
    %cst_8 = arith.constant dense<0.000000e+00> : vector<1xf32>
    %22 = vector.multi_reduction <add>, %21, %cst_8 [1, 2] : vector<1x3x128xf32> to vector<1xf32>
    %23 = vector.shape_cast %22 : vector<1xf32> to vector<1x1x1xf32>
    %24 = vector.extract %23[0, 0, 0] : f32 from vector<1x1x1xf32>
    %25 = vector.broadcast %24 : f32 to vector<1x1xf32>
    %26 = arith.addf %20, %25 : vector<1x1xf32>
    %c0_9 = arith.constant 0 : index
    %c0_10 = arith.constant 0 : index
    %27 = vector.load %arg4[%c0_9, %c0_10] : memref<1x1xf32, #tpu.memory_space<vmem>>, vector<1x1xf32>
    tpu.vector_store %arg4[%c0_9, %c0_10], %26 {strides = array<i32>} : memref<1x1xf32, #tpu.memory_space<vmem>>, vector<1x1xf32>,
    %c2_i32 = arith.constant 2 : i32
    %28 = arith.cmpi eq, %arg0, %c2_i32 : i32
    %29 = arith.extui %28 : i1 to i32
    %c0_i32_11 = arith.constant 0 : i32
    %30 = arith.cmpi ne, %29, %c0_i32_11 : i32
    scf.if %30 {
      %c0_12 = arith.constant 0 : index
      %c0_13 = arith.constant 0 : index
      %31 = vector.load %arg4[%c0_12, %c0_13] : memref<1x1xf32, #tpu.memory_space<vmem>>, vector<1x1xf32>
      %cst_14 = arith.constant 0.00111111114 : f32
      %32 = vector.broadcast %cst_14 : f32 to vector<1x1xf32>
      %33 = arith.mulf %31, %32 : vector<1x1xf32>
      %c0_15 = arith.constant 0 : index
      %c0_16 = arith.constant 0 : index
      %34 = vector.load %arg4[%c0_15, %c0_16] : memref<1x1xf32, #tpu.memory_space<vmem>>, vector<1x1xf32>
      tpu.vector_store %arg4[%c0_15, %c0_16], %33 {strides = array<i32>} : memref<1x1xf32, #tpu.memory_space<vmem>>, vector<1x1xf32>,
    } else {
    }
    return
  }
  func.func @transform_0(%arg0: i32) -> (i32, i32) {
    %c0_i32 = arith.constant 0 : i32
    %c0_i32_0 = arith.constant 0 : i32
    return %c0_i32, %arg0 : i32, i32
  }
  func.func @transform_1(%arg0: i32) -> (i32, i32) {
    %c0_i32 = arith.constant 0 : i32
    %c0_i32_0 = arith.constant 0 : i32
    return %c0_i32, %arg0 : i32, i32
  }
  func.func @transform_2(%arg0: i32) -> (i32, i32) {
    %c0_i32 = arith.constant 0 : i32
    %c0_i32_0 = arith.constant 0 : i32
    %c0_i32_1 = arith.constant 0 : i32
    return %c0_i32, %c0_i32_0 : i32, i32
  }
  func.func @transform_3(%arg0: i32) -> (i32, i32) {
    %c0_i32 = arith.constant 0 : i32
    %c0_i32_0 = arith.constant 0 : i32
    %c0_i32_1 = arith.constant 0 : i32
    return %c0_i32, %c0_i32_0 : i32, i32
  }
}

</mosaic_0001>

<bundles_post_ra>
// kernel: tpu_custom_call.1
= control target key start
LH: loop header
LB: loop body
LE: loop exit
PB: predicated region body
PF: predicated region fallthrough
CT: control target
= control target key end

     0   :  { %8 = vsyncpa [#allocation3], 0  ;;  %s630_s0 = inlined_call_operand.hbm [shape: f32[3,384], index: 0, kind: input, shape index: {}]   ;;  %s631_s1 = inlined_call_operand.vmem [shape: f32[1,384], index: 1, kind: input, shape index: {}]   ;;  %s632_s2 = inlined_call_operand.vmem [shape: f32[3,1], index: 2, kind: input, shape index: {}]   ;;  %s633_s3 = inlined_call_operand.hbm [shape: f32[1,1], index: 3, kind: output, shape index: {}]  }
   0x1   :  { %10 = vsyncpa [#allocation3 + $0x1], 0 }
   0x2   :  { %11 = vsyncpa [#allocation4], 0  ;;  %s494_s12 = smov 0   ;;  %s496_s13 = smov 0  }
   0x3   :  { %s498_s14 = smov 0   ;;  %s500_s15 = smov 0  }
   0x4 LB: > { %s513_s16 = sadd.s32 4294967295, %s468_s15   ;;  %s516_s17 = sadd.s32 1, %s468_s15   ;;  %s468_s15 = sphi %s500_s15, %s641_s15   ;;  %s464_s14 = sphi %s498_s14, %s640_s14   ;;  %s460_s13 = sphi %s496_s13, %s639_s13   ;;  %s456_s12 = sphi %s494_s12, %s638_s12  }
   0x5   : > { %s21_s18 = ssub.s32 %s468_s15, %s516_s17  ;;  %s24_s19 = sadd.s32 1, %s464_s14 }
   0x6   : > { %p22_p0 = scmp.eq.s32.totalorder %s21_s18, 0  ;;  %p31_p1 = scmp.ne.s32.totalorder %s464_s14, %s460_s13 }
   0x7   : > { %p32_p2 = scmp.eq.s32.totalorder %s468_s15, 0  ;;  %p37_p3 = scmp.ne.s32.totalorder %s460_s13, %s456_s12 }
   0x8   : > { %s526_s20 = scalar_select %p22_p0, %s464_s14, %s24_s19  }
   0x9   : > { %p33_p4 = por %p32_p2, %p31_p1  ;;  %p38_p5 = scmp.eq.s32.totalorder %s513_s16, 0 }
   0xa   : > { %p335_p6 = scmp.lt.s32.totalorder %s468_s15, 3  ;;  %s132_s22 = sand.u32 1, %s464_s14  }
   0xb   : > { %p530_p7 = por %p38_p5, %p37_p3  ;;  %s311_s23 = sshll.u32 %s132_s22, 2 }
   0xc   : > { %s312_s24 = sshll.u32 %s468_s15, 6  ;;  %s136_s28 = scalar_lea.vmem [#allocation2], %s311_s23 }
   0xd   : > { %s539_s27 = scalar_lea.hbm %s630_s0, %s312_s24  ;;  %s143_s29 = sshll.u32 %s136_s28, 4  ;;  %s541_s29 = int_to_ptr.vmem [resolvable:$true] %s143_s29 }
   0xe   : > { %p543_p8 = pnand %p335_p6, %p33_p4  ;;  %s133_s4 = scalar_lea.sflag [#allocation3], %s132_s22 }
   0xf   : > { %s374_s5 = scalar_lea.hbm %s539_s27, 64  ;;  %s379_s8 = scalar_lea.hbm %s630_s0, 192 }
  0x10   : > { %p375_p11 = scmp.ne.s32.totalorder %s539_s27, %s374_s5  ;;  %p376_p12 = pneg %p543_p8 }
  0x11   : > { %p380_p1 = scmp.lt.u32.totalorder %s539_s27, %s630_s0  ;;  %p381_p2 = scmp.lt.u32.totalorder %s379_s8, %s374_s5 }
  0x12   : > { %p377_p13 = pnand %p376_p12, %p375_p11  ;;  %p383_p4 = scmp.lt.u32.totalorder %s374_s5, %s539_s27 }
  0x13   : > { %p382_p3 = por %p381_p2, %p380_p1 }
  0x14   : > { %p378_p0 = pneg %p377_p13 }
  0x15   : > { %p384_p5 = por %p383_p4, %p382_p3 }
  0x17   : > { %p385_p6 = pnand %p384_p5, %p378_p0 }
  0x19   : > { %388 = shalt.err (!%p385_p6)
}
  0x1a   : > { %s389_s11 = scalar_lea.vmem %s541_s29, 64  ;;  %s470_s12 = smov [#allocation2]  }
  0x1b   : > { %p390_p11 = scmp.ne.s32.totalorder %s541_s29, %s389_s11  ;;  %s394_s18 = sshll.u32 %s470_s12, 4  ;;  %s395_s18 = int_to_ptr.vmem [resolvable:$false] %s394_s18 }
  0x1c   : > { %s396_s19 = scalar_lea.vmem %s395_s18, 128  ;;  %p397_p10 = scmp.lt.s32.totalorder %s541_s29, %s395_s18 }
  0x1d   : > { %p392_p13 = pnand %p390_p11, %p376_p12  ;;  %p398_p1 = scmp.lt.s32.totalorder %s396_s19, %s389_s11 }
  0x1f   : > { %p393_p9 = pneg %p392_p13  ;;  %p399_p2 = por %p398_p1, %p397_p10 }
  0x21   : > { %p400_p3 = pnand %p399_p2, %p393_p9 }
  0x23   : > { %403 = shalt.err (!%p400_p3)
}
  0x24   : > { %334 = dma.hbm_to_vmem [thread:$0]  (!%p543_p8), %s539_s27, 64, %s541_s29, %s133_s4  }
  0x25   : > { %p636_p0 = scmp.lt.s32.totalorder %s468_s15, 4  ;;  %p637_p4 = scmp.ge.s32.totalorder %s468_s15, 1 }
  0x27   : > { %p155_p12 = pnand %p637_p4, %p636_p0 }
  0x28   : > { %s160_s22 = sand.u32 (!%p155_p12), 1, %s460_s13  }
  0x29   : > { %158 = sbr.rel (%p155_p12) target bundleno = 440 (0x1b8), region = 32  ;;  %s314_s23 = sshll.u32 (!%p155_p12), %s160_s22, 2 }
  0x2a   : > { %s161_s24 = scalar_lea.sflag (!%p155_p12), [#allocation3], %s160_s22  ;;  %s164_s25 = scalar_lea.vmem (!%p155_p12), [#allocation2], %s314_s23 }
  0x30   : > { %447 = dma.done.wait (%p530_p7), %s161_s24, 64  }
  0x31   : > { %449 = vsyncadd (%p530_p7), %s161_s24, 4294967232  ;;  %p185_p9 = scmp.lt.s32.totalorder %s513_s16, 2  ;;  %p315_p8 = scmp.ne.s32.totalorder %s513_s16, 0 }
  0x32   : > { %vm192_vm0 = vcmask (!%p315_p8), 0   ;;  %v471_v0 = vmov (!%p315_p8), 0.0  }
  0x33   : > { %s186_s26 = scalar_select %p185_p9, %s513_s16, 2 }
  0x34   : > { %191 = sbr.rel (%p315_p8) target bundleno = 59 (0x3b), region = 40  ;;  %193 = vst.msk [vmem:[#allocation5] sm:$0x1] (!%p315_p8), %vm192_vm0, %v471_v0 }
  0x35   : > { %s187_s15 = scalar_lea.vmem %s631_s1, %s186_s26 }
  0x3b PF: > { %v196_v1 = vld [vmem:[%s632_s2] sm:$0x7]  ;;  %v472_v2 = vmov 0   ;;  %v212_v3 = vlaneseq  ;;  %s317_s21 = sshll.u32 %s513_s16, 7  ;;  %vm220_vm2 = vcmask 1042432   ;;  %vm233_vm3 = vcmask 0  }
  0x3c   : > { %373 = vset.pattern.permute.xlu0 %v472_v2  ;;  %v194_v4 = vld [vmem:[%s164_s25] sm:$0x7]  ;;  %v215_v8 = vstv %s317_s21  ;;  %v219_v23 = vld [vmem:[#allocation5] sm:$0x1]  ;;  %p318_p7 = scmp.ne.s32.totalorder %s513_s16, 2 }
  0x3d   : > { %206 = vperm.xlu0 %373, %v196_v1   ;;  %v316_v5 = vld [vmem:[%s187_s15] ss:$0 sm:$0xff]  ;;  %v213_v6 = vand.u32 127, %v212_v3 }
  0x3e   : > { %v203_v7 = vsub.f32 %v316_v5, %v194_v4 }
  0x3f   : > { %v216_v10 = vadd.s32 %v215_v8, %v213_v6 }
  0x41   : > { %vm217_vm1 = vcmp.lt.s32.totalorder %v216_v10, 300 }
  0xbc   : > { %v207_v9 = vpop.permute.xlu0 %206 }
  0xbd   : > { %v209_v11 = vmul.f32 %v207_v9, %v203_v7 }
  0xbf   : > { %v210_v12 = vsub.f32 %v209_v11, %v203_v7 }
  0xc1   : > { %v211_v13 = vmax.f32 %v209_v11, %v210_v12 }
  0xc3   : > { %v218_v14 = vsel %vm217_vm1, %v211_v13, 0.0 }
  0xc4   : > { %v221_v15 = vsel %vm220_vm2, %v218_v14, 0.0 }
  0xc5   : > { %222 = vadd.xlane.f32.xlu0 %v221_v15 }
 0x152   : > { %v223_v16 = vpop.xlane.xlu0 %222 }
 0x153   : > { %v224_v17 = vrot.slane %v223_v16, 4 }
 0x155   : > { %v225_v18 = vadd.f32 %v224_v17, %v223_v16 }
 0x157   : > { %v226_v19 = vrot.slane %v225_v18, 2 }
 0x159   : > { %v227_v20 = vadd.f32 %v226_v19, %v225_v18 }
 0x15b   : > { %v228_v21 = vrot.slane %v227_v20, 1 }
 0x15d   : > { %v229_v22 = vadd.f32 %v228_v21, %v227_v20 }
 0x15f   : > { %323 = vpush %v229_v22 }
 0x18e   : > { %238 = sbr.rel (%p318_p7) target bundleno = 415 (0x19f), region = 44 }
 0x190   : > { %s324_s4 = spop %323 }
 0x191   : > { %v231_v24 = vstv %s324_s4 }
 0x192   : > { %v232_v25 = vadd.f32 %v231_v24, %v219_v23 }
 0x194   : > { %234 = vst.msk [vmem:[#allocation5] sm:$0x1] %vm233_vm3, %v232_v25 }
 0x19b   : > { %v239_v26 = vld [vmem:[#allocation5] sm:$0x1] }
 0x19c   : > { %v240_v27 = vmul.f32 0.0011111111, %v239_v26 }
 0x19e   : > { %241 = vst.msk [vmem:[#allocation5] sm:$0x1] %vm233_vm3, %v240_v27 }
 0x19f PF: > { %p336_p10 = scmp.eq.s32.totalorder %s513_s16, 2  ;;  %s473_s5 = smov [#allocation5]  }
 0x1a0   : > { %s249_s6 = sshll.u32 %s473_s5, 4  ;;  %s250_s6 = int_to_ptr.vmem [resolvable:$true] %s249_s6 }
 0x1a1   : > { %s404_s7 = scalar_lea.vmem %s250_s6, 16  ;;  %s410_s8 = scalar_lea.vmem %s250_s6, 32 }
 0x1a2   : > { %p405_p5 = scmp.ne.s32.totalorder %s250_s6, %s404_s7  ;;  %p411_p13 = scmp.lt.s32.totalorder %s250_s6, %s250_s6 }
 0x1a3   : > { %p412_p1 = scmp.lt.s32.totalorder %s410_s8, %s404_s7 }
 0x1a4   : > { %p406_p6 = pnand %p405_p5, %p336_p10 }
 0x1a5   : > { %p413_p2 = por %p412_p1, %p411_p13 }
 0x1a6   : > { %p407_p11 = pneg %p406_p6 }
 0x1a8   : > { %p414_p3 = pnand %p413_p2, %p407_p11 }
 0x1aa   : > { %417 = shalt.err (!%p414_p3)
}
 0x1ab   : > { %s418_s11 = scalar_lea.hbm %s633_s3, 16 }
 0x1ac   : > { %p419_p0 = scmp.ne.s32.totalorder %s633_s3, %s418_s11  ;;  %p424_p9 = scmp.lt.u32.totalorder %s418_s11, %s633_s3 }
 0x1ae   : > { %p420_p4 = pnand %p419_p0, %p336_p10 }
 0x1b0   : > { %p421_p12 = pneg %p420_p4 }
 0x1b2   : > { %p426_p8 = pnand %p424_p9, %p421_p12 }
 0x1b4   : > { %429 = shalt.err (!%p426_p8)
}
 0x1b5   : > { %328 = dma.vmem_to_hbm [thread:$0]  (%p336_p10), %s250_s6, 16, %s633_s3, [#allocation4]  }
 0x1b6   : > { %451 = dma.done.wait (%p336_p10), [#allocation4], 16  }
 0x1b7   : > { %453 = vsyncadd (%p336_p10), [#allocation4], 4294967280 }
 0x1b8 PF: > { %p14_p7 = scmp.ge.s32.totalorder %s516_s17, 5   ;;  %s638_s12 = smov %s460_s13 }
 0x1b9   : > { %s639_s13 = smov %s464_s14  ;;  %s640_s14 = smov %s526_s20 }
 0x1ba   : > { %s641_s15 = smov %s516_s17  ;;  %16 = sbr.rel (!%p14_p7) target bundleno = 4 (0x4), region = 80 }
 0x1c1   :  { %262 = vsyncpa [#allocation3], 1 }
 0x1c2   :  { %264 = vsyncpa [#allocation3 + $0x1], 1 }
 0x1c3   :  { %265 = vsyncpa [#allocation4], 1 }
 0x1c4   :  { %267 = vsyncpa [#allocation4 + $0x1], 1 }

</bundles_post_ra>
